<compile_context>
chip_gen: v6e
topology: v6e:2x2x1
jax: 0.10.0
libtpu: 0.0.40
codegen_flags: <defaults>
</compile_context>

<pallas_src>
import functools

import jax
import jax.numpy as jnp
from jax.experimental import pallas as pl
from jax.experimental.pallas import tpu as pltpu


def _withbias_layernorm_kernel(x_ref, w_ref, b_ref, ones_ref, o_ref, *, use_mxu):
    # x_ref: (TM, C) tile of rows; w_ref/b_ref: (1, C); ones_ref: (C, n_out).
    x = x_ref[...].astype(jnp.float32)
    inv_c = 1.0 / x.shape[-1]

    if use_mxu:
        ones = ones_ref[...]
        # Row sums on the MXU (idle otherwise); XLU stays free for layout work.
        mu = jnp.dot(x, ones, preferred_element_type=jnp.float32) * inv_c
        xc = x - mu                                   # reused for var and y
        var = jnp.dot(xc * xc, ones, preferred_element_type=jnp.float32) * inv_c
    else:
        # Bit-parity fallback (XLU reductions), selectable from the wrapper.
        mu = jnp.mean(x, axis=-1, keepdims=True)
        xc = x - mu
        var = jnp.mean(xc * xc, axis=-1, keepdims=True)   # unbiased=False

    y = xc * jax.lax.rsqrt(var + 1e-5)                # rsqrt -> EUP slot
    w = w_ref[...].astype(jnp.float32)
    b = b_ref[...].astype(jnp.float32)
    o_ref[...] = (y * w + b).astype(o_ref.dtype)


def _sublane_multiple(dtype):
    # Sublane packing: 8 for f32, 16 for bf16/f16, 32 for int8/fp8.
    return max(8, 32 // jnp.dtype(dtype).itemsize)


def _vmem_capacity_bytes():
    try:
        return int(pltpu.get_tpu_info().vmem_capacity_bytes)
    except Exception:
        return 64 << 20   # conservative fallback (v7x per-core VMEM)


def _pick_tile_rows(rows, C, dtype, vmem_cap, min_grid_steps=8):
    """Sublane-aligned row tile sized for the HBM roofline and real VMEM use."""
    itemsize = jnp.dtype(dtype).itemsize
    sub = _sublane_multiple(dtype)
    if rows <= sub:
        return rows                                   # single full-extent block

    # Generation-aware input-block target: a few MiB already sits at ~85% of
    # roofline on v5e/v6e; v7x's ~3.2 TB/s wants a slightly larger block to
    # keep the ~0.35us/step overhead small.
    small_vmem = vmem_cap <= (96 << 20)               # v7x: 64 MiB; v5e/v6e: 128 MiB
    target_in_block = (6 << 20) if small_vmem else (4 << 20)

    # Per-row VMEM footprint: double-buffered in + out blocks at the input
    # dtype PLUS ~4 full-tile fp32 temporaries (x, mu/xc, squares, y) that the
    # kernel materializes — so bf16/int8 inputs don't bust VMEM either.
    per_row_bytes = C * (4 * itemsize + 4 * 4)
    rows_by_vmem = max(sub, (vmem_cap // 2) // per_row_bytes)
    rows_by_target = max(sub, target_in_block // (C * itemsize))
    tile = min(rows_by_vmem, rows_by_target, rows)

    # Keep >= min_grid_steps so the "parallel" axis shards across both v7x
    # TensorCores with reasonable balance.
    if rows > min_grid_steps * sub:
        tile = min(tile, pl.cdiv(rows, min_grid_steps))
    tile = max(sub, (tile // sub) * sub)

    # Rebalance: prefer an even step count (megacore) and avoid a tiny tail.
    steps = pl.cdiv(rows, tile)
    if steps > 1 and steps % 2 == 1:
        steps += 1
    tile = max(sub, sub * pl.cdiv(pl.cdiv(rows, steps), sub))
    return tile


def withbias_layernorm(x, weight, bias, *, tile_rows=None, reduce_via_mxu=True):
    """x: (..., C); weight, bias: (C,). LayerNorm over the last dim."""
    orig_shape = x.shape
    C = orig_shape[-1]
    rows = 1
    for d in orig_shape[:-1]:
        rows *= d
    x2 = x.reshape(rows, C)
    w2 = weight.reshape(1, C)
    b2 = bias.reshape(1, C)

    vmem_cap = _vmem_capacity_bytes()
    if tile_rows is None:
        tile_rows = _pick_tile_rows(rows, C, x.dtype, vmem_cap)

    # MXU reduction operand.  n_out == C (for C <= 256) returns the row sum
    # already lane-broadcast; for large C use a (C, 1) ones vector.
    n_out = C if C <= 256 else 1
    ones = jnp.ones((C, n_out), jnp.float32)

    # Ragged tail handled by Pallas: the last block's OOB rows are computed
    # (independently per row, garbage stays in those rows) and their stores
    # are masked; no wrapper-side padding / slicing HBM copies.
    grid = (pl.cdiv(rows, tile_rows),)

    # VMEM budget: double-buffered in/out blocks + fp32 temporaries + params.
    itemsize = jnp.dtype(x.dtype).itemsize
    block_bytes = tile_rows * C * (4 * itemsize + 4 * 4)
    param_bytes = 2 * (2 * C * itemsize + C * n_out * 4)
    needed = block_bytes + param_bytes + (2 << 20)
    vmem_limit = max(needed, min(32 << 20, vmem_cap - (8 << 20)))

    kernel = functools.partial(_withbias_layernorm_kernel, use_mxu=reduce_via_mxu)

    out = pl.pallas_call(
        kernel,
        out_shape=jax.ShapeDtypeStruct((rows, C), x.dtype),
        grid_spec=pltpu.PrefetchScalarGridSpec(
            num_scalar_prefetch=0,
            grid=grid,
            in_specs=[
                pl.BlockSpec((tile_rows, C), lambda i: (i, 0)),
                pl.BlockSpec((1, C), lambda i: (0, 0)),        # weight (fetched once)
                pl.BlockSpec((1, C), lambda i: (0, 0)),        # bias   (fetched once)
                pl.BlockSpec((C, n_out), lambda i: (0, 0)),    # ones   (fetched once)
            ],
            out_specs=pl.BlockSpec((tile_rows, C), lambda i: (i, 0)),
        ),
        compiler_params=pltpu.CompilerParams(
            dimension_semantics=("parallel",),      # shards row blocks on v7x
            vmem_limit_bytes=int(vmem_limit),
        ),
    )(x2, w2, b2, ones)

    return out.reshape(orig_shape)


if __name__ == "__main__":
    key = jax.random.PRNGKey(0)
    kx, kw, kb = jax.random.split(key, 3)

    # Small shapes; rows = 2*63 = 126 is NOT a multiple of the row tile, so
    # this also exercises the cdiv / masked-tail path.  C=128 is lane-dense.
    B, T, C = 2, 63, 128
    x = jax.random.normal(kx, (B, T, C), dtype=jnp.float32)
    # Module __init__ uses ones/zeros; perturb them so the affine path is
    # actually exercised numerically (still deterministic from PRNGKey(0)).
    weight = 1.0 + 0.1 * jax.random.normal(kw, (C,), dtype=jnp.float32)
    bias = 0.1 * jax.random.normal(kb, (C,), dtype=jnp.float32)

    y = withbias_layernorm(x, weight, bias)
    y = jax.block_until_ready(y)

    # Reference check (plain JAX, same semantics as the PyTorch forward).
    mu = jnp.mean(x, axis=-1, keepdims=True)
    var = jnp.mean((x - mu) ** 2, axis=-1, keepdims=True)
    ref = (x - mu) / jnp.sqrt(var + 1e-5) * weight + bias

    # Tolerance note: the row reductions ride the MXU; at default matmul
    # precision f32 operands may go through bf16 passes, bounding the error
    # at ~1e-3 for unit-scale activations (an exact-f32 lowering gives <1e-5).
    # Use reduce_via_mxu=False for bit-level parity via the XLU-reduction path.
    err = float(jnp.max(jnp.abs(y - ref)))
    assert err < 5e-3, f"mismatch vs reference: max|err|={err}"

    print("KERNEL_OK")
</pallas_src>

<mosaic_0001>
module attributes {stable_mosaic.version = 11 : i64} {
  func.func @_withbias_layernorm_kernel(%arg0: i32, %arg1: memref<16x128xf32, #tpu.memory_space<vmem>>, %arg2: memref<1x128xf32, #tpu.memory_space<vmem>>, %arg3: memref<1x128xf32, #tpu.memory_space<vmem>>, %arg4: memref<128x128xf32, #tpu.memory_space<vmem>>, %arg5: memref<16x128xf32, #tpu.memory_space<vmem>>) attributes {dimension_semantics = [#tpu.dimension_semantics<parallel>], iteration_bounds = array<i64: 8>, scalar_prefetch = 0 : i64, scratch_operands = 0 : i64, tpu.core_type = #tpu.core_type<tc>, window_params = [{transform_indices = @transform_0, window_bounds = array<i64: 16, 128>}, {pipeline_mode = #tpu.pipeline_mode<synchronous>, transform_indices = @transform_1, window_bounds = array<i64: 1, 128>}, {pipeline_mode = #tpu.pipeline_mode<synchronous>, transform_indices = @transform_2, window_bounds = array<i64: 1, 128>}, {pipeline_mode = #tpu.pipeline_mode<synchronous>, transform_indices = @transform_3, window_bounds = array<i64: 128, 128>}, {transform_indices = @transform_4, window_bounds = array<i64: 16, 128>}]} {
    %c0 = arith.constant 0 : index
    %c0_0 = arith.constant 0 : index
    %0 = vector.load %arg1[%c0, %c0_0] : memref<16x128xf32, #tpu.memory_space<vmem>>, vector<16x128xf32>
    %c0_1 = arith.constant 0 : index
    %c0_2 = arith.constant 0 : index
    %1 = vector.load %arg4[%c0_1, %c0_2] : memref<128x128xf32, #tpu.memory_space<vmem>>, vector<128x128xf32>
    %cst = arith.constant dense<0.000000e+00> : vector<16x128xf32>
    %2 = tpu.matmul %0, %1, %cst {dimension_numbers = #tpu.dot_dimension_numbers<[1], [0], [0], [1], [0, 0, 1, 1], [], []>} : vector<16x128xf32>, vector<128x128xf32>, vector<16x128xf32> -> vector<16x128xf32>
    %cst_3 = arith.constant 7.812500e-03 : f32
    %3 = vector.broadcast %cst_3 : f32 to vector<16x128xf32>
    %4 = arith.mulf %2, %3 : vector<16x128xf32>
    %5 = arith.subf %0, %4 : vector<16x128xf32>
    %6 = arith.mulf %5, %5 : vector<16x128xf32>
    %cst_4 = arith.constant dense<0.000000e+00> : vector<16x128xf32>
    %7 = tpu.matmul %6, %1, %cst_4 {dimension_numbers = #tpu.dot_dimension_numbers<[1], [0], [0], [1], [0, 0, 1, 1], [], []>} : vector<16x128xf32>, vector<128x128xf32>, vector<16x128xf32> -> vector<16x128xf32>
    %cst_5 = arith.constant 7.812500e-03 : f32
    %8 = vector.broadcast %cst_5 : f32 to vector<16x128xf32>
    %9 = arith.mulf %7, %8 : vector<16x128xf32>
    %cst_6 = arith.constant 9.99999974E-6 : f32
    %10 = vector.broadcast %cst_6 : f32 to vector<16x128xf32>
    %11 = arith.addf %9, %10 : vector<16x128xf32>
    %12 = math.rsqrt %11 : vector<16x128xf32>
    %13 = arith.mulf %5, %12 : vector<16x128xf32>
    %c0_7 = arith.constant 0 : index
    %c0_8 = arith.constant 0 : index
    %14 = vector.load %arg2[%c0_7, %c0_8] : memref<1x128xf32, #tpu.memory_space<vmem>>, vector<1x128xf32>
    %c0_9 = arith.constant 0 : index
    %c0_10 = arith.constant 0 : index
    %15 = vector.load %arg3[%c0_9, %c0_10] : memref<1x128xf32, #tpu.memory_space<vmem>>, vector<1x128xf32>
    %16 = vector.broadcast %14 : vector<1x128xf32> to vector<16x128xf32>
    %17 = arith.mulf %13, %16 : vector<16x128xf32>
    %18 = vector.broadcast %15 : vector<1x128xf32> to vector<16x128xf32>
    %19 = arith.addf %17, %18 : vector<16x128xf32>
    %c0_11 = arith.constant 0 : index
    %c0_12 = arith.constant 0 : index
    %20 = vector.load %arg5[%c0_11, %c0_12] : memref<16x128xf32, #tpu.memory_space<vmem>>, vector<16x128xf32>
    tpu.vector_store %arg5[%c0_11, %c0_12], %19 {strides = array<i32>} : memref<16x128xf32, #tpu.memory_space<vmem>>, vector<16x128xf32>,
    return
  }
  func.func @transform_0(%arg0: i32) -> (i32, i32) {
    %c0_i32 = arith.constant 0 : i32
    %c0_i32_0 = arith.constant 0 : i32
    return %arg0, %c0_i32 : i32, i32
  }
  func.func @transform_1(%arg0: i32) -> (i32, i32) {
    %c0_i32 = arith.constant 0 : i32
    %c0_i32_0 = arith.constant 0 : i32
    %c0_i32_1 = arith.constant 0 : i32
    return %c0_i32, %c0_i32_0 : i32, i32
  }
  func.func @transform_2(%arg0: i32) -> (i32, i32) {
    %c0_i32 = arith.constant 0 : i32
    %c0_i32_0 = arith.constant 0 : i32
    %c0_i32_1 = arith.constant 0 : i32
    return %c0_i32, %c0_i32_0 : i32, i32
  }
  func.func @transform_3(%arg0: i32) -> (i32, i32) {
    %c0_i32 = arith.constant 0 : i32
    %c0_i32_0 = arith.constant 0 : i32
    %c0_i32_1 = arith.constant 0 : i32
    return %c0_i32, %c0_i32_0 : i32, i32
  }
  func.func @transform_4(%arg0: i32) -> (i32, i32) {
    %c0_i32 = arith.constant 0 : i32
    %c0_i32_0 = arith.constant 0 : i32
    return %arg0, %c0_i32 : i32, i32
  }
}

</mosaic_0001>

<bundles_post_ra>
// kernel: tpu_custom_call.1
= control target key start
LH: loop header
LB: loop body
LE: loop exit
PB: predicated region body
PF: predicated region fallthrough
CT: control target
= control target key end

     0   :  { %9 = vsyncpa [#allocation3], 0  ;;  %s1078_s0 = inlined_call_operand.hbm [shape: f32[126,128], index: 0, kind: input, shape index: {}]   ;;  %s1079_s1 = inlined_call_operand.vmem [shape: f32[1,128], index: 1, kind: input, shape index: {}]   ;;  %s1080_s2 = inlined_call_operand.vmem [shape: f32[1,128], index: 2, kind: input, shape index: {}]   ;;  %s1081_s3 = inlined_call_operand.hbm [shape: f32[128,128], index: 3, kind: input, shape index: {}]   ;;  %s1082_s4 = inlined_call_operand.hbm [shape: f32[126,128], index: 4, kind: output, shape index: {}]  }
   0x1   :  { %11 = vsyncpa [#allocation3 + $0x1], 0 }
   0x2   :  { %12 = vsyncpa [#allocation6], 0 }
   0x3   :  { %13 = vsyncpa [#allocation4], 0 }
   0x4   :  { %15 = vsyncpa [#allocation4 + $0x1], 0  ;;  %s879_s15 = smov 0   ;;  %s881_s16 = smov 0  }
   0x5   :  { %s883_s17 = smov 0   ;;  %s885_s18 = smov 0  }
   0x6 LB: > { %s900_s19 = sadd.s32 4294967295, %s845_s18   ;;  %s532_s20 = sadd.s32 4294967294, %s845_s18   ;;  %s845_s18 = sphi %s885_s18, %s1103_s18   ;;  %s841_s17 = sphi %s883_s17, %s1102_s17   ;;  %s837_s16 = sphi %s881_s16, %s1101_s16   ;;  %s833_s15 = sphi %s879_s15, %s1100_s15  }
   0x7   : > { %p41_p0 = scmp.ne.s32.totalorder %s837_s16, %s833_s15  ;;  %p1083_p1 = scmp.eq.s32.totalorder %s900_s19, 0 }
   0x8   : > { %p134_p3 = scmp.eq.s32.totalorder %s532_s20, 7  ;;  %p533_p5 = scmp.ge.s32.totalorder %s845_s18, 1 }
   0x9   : > { %p909_p4 = por %p1083_p1, %p41_p0  ;;  %p141_p7 = scmp.lt.s32.totalorder %s845_s18, 9 }
   0xa   : > { %p914_p6 = por %p134_p3, %p41_p0  ;;  %s847_s24 = smov [#allocation5]  }
   0xb   : > { %s1087_s21 = scalar_select %p909_p4, 1, 0 }
   0xc   : > { %s1088_s22 = scalar_select %p914_p6, 1, 0 }
   0xd   : > { %p919_p8 = pnand %p533_p5, %p141_p7  ;;  %s159_s25 = sshll.u32 %s847_s24, 4  ;;  %s160_s25 = int_to_ptr.vmem [resolvable:$true] %s159_s25 }
   0xe   : > { %s932_s27 = sadd.s32 1, %s845_s18   ;;  %s28_s28 = sadd.s32 1, %s841_s17 }
   0xf   : > { %s1089_s23 = scalar_select %p919_p8, 1, 0 }
  0x10   : > { %p666_p9 = pneg %p919_p8  ;;  %s25_s29 = ssub.s32 %s845_s18, %s932_s27 }
  0x11   : > { %s734_s30 = scalar_lea.vmem %s160_s25, 2048  ;;  %p742_p3 = scmp.lt.s32.totalorder %s160_s25, %s160_s25 }
  0x12   : > { %p927_p10 = pnand %p666_p9, %p1083_p1  ;;  %p735_p12 = scmp.ne.s32.totalorder %s160_s25, %s734_s30 }
  0x13   : > { %p743_p5 = scmp.lt.s32.totalorder %s734_s30, %s734_s30 }
  0x14   : > { %p725_p11 = pneg %p927_p10 }
  0x15   : > { %p744_p7 = por %p743_p5, %p742_p3 }
  0x16   : > { %p737_p13 = pnand %p735_p12, %p725_p11 }
  0x18   : > { %p738_p0 = pneg %p737_p13 }
  0x1a   : > { %p745_p2 = pnand %p744_p7, %p738_p0 }
  0x1c   : > { %748 = shalt.err (!%p745_p2)
}
  0x1d   : > { %s848_s5 = smov 128   ;;  %s849_s6 = smov 8  }
  0x1e   : > { %669 = dma.hbm_to_vmem [thread:$0]  (!%p927_p10), %s1081_s3, 2048, %s160_s25, [#allocation6], %s848_s5, %s848_s5, %s849_s6  }
  0x1f   : > { %p26_p2 = scmp.eq.s32.totalorder %s25_s29, 0  ;;  %p35_p9 = scmp.ne.s32.totalorder %s841_s17, %s837_s16 }
  0x20   : > { %p36_p11 = scmp.eq.s32.totalorder %s845_s18, 0  ;;  %p679_p12 = scmp.lt.s32.totalorder %s845_s18, 8 }
  0x21   : > { %s952_s9 = scalar_select %p26_p2, %s841_s17, %s28_s28  }
  0x22   : > { %p37_p13 = por %p36_p11, %p35_p9  ;;  %p1091_p0 = scmp.eq.s32.totalorder %s900_s19, 7 }
  0x23   : > { %s173_s11 = sand.u32 1, %s841_s17   ;;  %s550_s12 = sshll.u32 %s845_s18, 8 }
  0x24   : > { %p956_p3 = por %p1091_p0, %p35_p9  ;;  %s536_s13 = sshll.u32 %s173_s11, 4 }
  0x25   : > { %s965_s24 = scalar_lea.hbm %s1078_s0, %s550_s12  ;;  %s177_s25 = scalar_lea.vmem [#allocation2], %s536_s13 }
  0x26   : > { %s1092_s10 = scalar_select %p956_p3, 1, 0 }
  0x27   : > { %s184_s26 = sshll.u32 %s177_s25, 4  ;;  %p967_p10 = pnand %p679_p12, %p37_p13  ;;  %s971_s26 = int_to_ptr.vmem [resolvable:$true] %s184_s26 }
  0x28   : > { %s973_s29 = scalar_lea.sflag [#allocation3], %s173_s11  ;;  %s749_s30 = scalar_lea.hbm %s965_s24, 256 }
  0x29   : > { %p750_p5 = scmp.ne.s32.totalorder %s965_s24, %s749_s30  ;;  %p751_p7 = pneg %p967_p10 }
  0x2a   : > { %s754_s12 = scalar_lea.hbm %s1078_s0, 2048  ;;  %p755_p11 = scmp.lt.s32.totalorder %s965_s24, %s1078_s0 }
  0x2b   : > { %p752_p2 = pnand %p751_p7, %p750_p5  ;;  %p756_p12 = scmp.lt.s32.totalorder %s754_s12, %s749_s30 }
  0x2d   : > { %p753_p9 = pneg %p752_p2  ;;  %p757_p13 = por %p756_p12, %p755_p11 }
  0x2f   : > { %p758_p0 = pnand %p757_p13, %p753_p9 }
  0x31   : > { %761 = shalt.err (!%p758_p0)
}
  0x32   : > { %s762_s11 = scalar_lea.vmem %s971_s26, 256  ;;  %s850_s20 = smov [#allocation2]  }
  0x33   : > { %p763_p1 = scmp.ne.s32.totalorder %s971_s26, %s762_s11  ;;  %s767_s25 = sshll.u32 %s850_s20, 4  ;;  %s768_s25 = int_to_ptr.vmem [resolvable:$false] %s767_s25 }
  0x34   : > { %s769_s7 = scalar_lea.vmem %s768_s25, 512  ;;  %p770_p2 = scmp.lt.s32.totalorder %s971_s26, %s768_s25 }
  0x35   : > { %p765_p6 = pnand %p763_p1, %p751_p7  ;;  %p771_p3 = scmp.lt.s32.totalorder %s769_s7, %s762_s11 }
  0x37   : > { %p766_p5 = pneg %p765_p6  ;;  %p772_p4 = por %p771_p3, %p770_p2 }
  0x39   : > { %p773_p8 = pnand %p772_p4, %p766_p5 }
  0x3b   : > { %776 = shalt.err (!%p773_p8)
}
  0x3c   : > { %673 = dma.hbm_to_vmem [thread:$0]  (!%p967_p10), %s965_s24, 256, %s971_s26, %s973_s29, %s848_s5, %s848_s5, %s849_s6  }
  0x3d   : > { %p1094_p1 = scmp.ne.s32.totalorder %s1089_s23, 0 }
  0x3e   : > { %s1000_s30 = sand.u32 (!%p1094_p1), 1, %s837_s16   ;;  %p1095_p4 = scmp.ne.s32.totalorder (!%p1094_p1), %s1087_s21, 0 }
  0x3f   : > { %196 = sbr.rel (%p1094_p1) target bundleno = 540 (0x21c), region = 36  ;;  %s540_s8 = sshll.u32 (!%p1094_p1), %s1000_s30, 4 }
  0x40   : > { %s199_s12 = scalar_lea.sflag (!%p1094_p1), [#allocation3], %s1000_s30  ;;  %s1006_s28 = scalar_lea.vmem (!%p1094_p1), [#allocation2], %s540_s8 }
  0x44   : > { %820 = dma.done.wait (%p1095_p4), %s199_s12, 256  }
  0x45   : > { %822 = vsyncadd (%p1095_p4), %s199_s12, 4294967040  ;;  %p1096_p6 = scmp.eq.s32.totalorder %s900_s19, 0 }
  0x47   : > { %824 = dma.done.wait (%p1096_p6), [#allocation6], 2048   ;;  %p1097_p8 = pmov %p1096_p6 }
  0x48   : > { %v250_v0 = vld [vmem:[#allocation5 + $0x78] sm:$0xff]  ;;  %v249_v1 = vld [vmem:[#allocation5 + $0x70] sm:$0xff]  ;;  %v248_v2 = vld [vmem:[#allocation5 + $0x68] sm:$0xff]  ;;  %s551_s24 = sshll.u32 %s900_s19, 8  ;;  %s230_s26 = scalar_lea.vmem [#allocation7], %s540_s8 }
  0x49   : > { %826 = vsyncadd (%p1097_p8), [#allocation6], 4294965248  ;;  %588 = vmatprep.subr.mxu0 %v250_v0  ;;  %623 = vmatprep.subr.mxu1 %v250_v0  ;;  %v247_v3 = vld [vmem:[#allocation5 + $0x60] sm:$0xff]  ;;  %v246_v5 = vld [vmem:[#allocation5 + $0x58] sm:$0xff]  ;;  %s449_s29 = sshll.u32 %s230_s26, 4  ;;  %s1034_s11 = scalar_lea.hbm %s1082_s4, %s551_s24  ;;  %s1036_s29 = int_to_ptr.vmem [resolvable:$true] %s449_s29 }
  0x4a   : > { %589 = vmatpush3.msra.mxu0 %v250_v0  ;;  %624 = vmatpush3.msra.mxu1 %v250_v0  ;;  %v1017_v4 = vld [vmem:[%s1006_s28] sm:$0xff]  ;;  %v244_v7 = vld [vmem:[#allocation5 + $0x48] sm:$0xff]  ;;  %v242_v9 = vld [vmem:[#allocation5 + $0x38] sm:$0xff]  ;;  %s436_s20 = scalar_lea.sflag [#allocation4], %s1000_s30  ;;  %s777_s19 = scalar_lea.vmem %s1036_s29, 256 }
  0x4b   : > { %590 = vmatprep.subr.mxu0 %v249_v1  ;;  %625 = vmatprep.subr.mxu1 %v249_v1  ;;  %v245_v6 = vld [vmem:[#allocation5 + $0x50] sm:$0xff]  ;;  %v243_v8 = vld [vmem:[#allocation5 + $0x40] sm:$0xff]  ;;  %v240_v11 = vld [vmem:[#allocation5 + $0x28] sm:$0xff]  ;;  %p778_p3 = scmp.ne.s32.totalorder %s1036_s29, %s777_s19  ;;  %p1098_p10 = scmp.ne.s32.totalorder %s1092_s10, 0 }
  0x4c   : > { %591 = vmatpush3.msra.mxu0 %v249_v1  ;;  %626 = vmatpush3.msra.mxu1 %v249_v1  ;;  %v241_v10 = vld [vmem:[#allocation5 + $0x30] sm:$0xff]  ;;  %v239_v12 = vld [vmem:[#allocation5 + $0x20] sm:$0xff]  ;;  %v238_v13 = vld [vmem:[#allocation5 + $0x18] sm:$0xff]  ;;  %s851_s25 = smov [#allocation7]  }
  0x4d   : > { %592 = vmatprep.subr.mxu0 %v248_v2  ;;  %627 = vmatprep.subr.mxu1 %v248_v2  ;;  %v237_v14 = vld [vmem:[#allocation5 + $0x10] sm:$0xff]  ;;  %v236_v15 = vld [vmem:[#allocation5 + $0x8] sm:$0xff]  ;;  %v235_v16 = vld [vmem:[#allocation5] sm:$0xff]  ;;  %p779_p7 = pnand %p778_p3, %p1098_p10  ;;  %s781_s7 = sshll.u32 %s851_s25, 4  ;;  %s782_s7 = int_to_ptr.vmem [resolvable:$false] %s781_s7 }
  0x4e   : > { %593 = vmatpush3.msra.mxu0 %v248_v2  ;;  %620 = vmatprep.mubr.f32.mxu0 %v1017_v4  ;;  %v234_v17 = vld [vmem:[%s1006_s28 + $0x8] sm:$0xff]  ;;  %v543_v33 = vld [vmem:[%s1079_s1] ss:$0 sm:$0xff]  ;;  %s783_s8 = scalar_lea.vmem %s782_s7, 512  ;;  %p784_p11 = scmp.lt.s32.totalorder %s1036_s29, %s782_s7 }
  0x4f   : > { %594 = vmatprep.subr.mxu0 %v247_v3  ;;  %628 = vmatpush3.msra.mxu1 %v248_v2  ;;  %v544_v36 = vld [vmem:[%s1080_s2] ss:$0 sm:$0xff]  ;;  %p780_p9 = pneg %p779_p7  ;;  %p785_p12 = scmp.lt.s32.totalorder %s783_s8, %s777_s19 }
  0x50   : > { %595 = vmatpush3.msra.mxu0 %v247_v3  ;;  %629 = vmatprep.subr.mxu1 %v247_v3 }
  0x51   : > { %596 = vmatprep.subr.mxu0 %v246_v5  ;;  %630 = vmatpush3.msra.mxu1 %v247_v3  ;;  %p786_p13 = por %p785_p12, %p784_p11 }
  0x52   : > { %597 = vmatpush3.msra.mxu0 %v246_v5  ;;  %631 = vmatprep.subr.mxu1 %v246_v5 }
  0x53   : > { %598 = vmatprep.subr.mxu0 %v245_v6  ;;  %632 = vmatpush3.msra.mxu1 %v246_v5  ;;  %p787_p0 = pnand %p786_p13, %p780_p9 }
  0x54   : > { %599 = vmatpush3.msra.mxu0 %v245_v6  ;;  %633 = vmatprep.subr.mxu1 %v245_v6 }
  0x55   : > { %600 = vmatprep.subr.mxu0 %v244_v7  ;;  %634 = vmatpush3.msra.mxu1 %v245_v6 }
  0x56   : > { %601 = vmatpush3.msra.mxu0 %v244_v7  ;;  %635 = vmatprep.subr.mxu1 %v244_v7 }
  0x57   : > { %602 = vmatprep.subr.mxu0 %v243_v8  ;;  %636 = vmatpush3.msra.mxu1 %v244_v7 }
  0x58   : > { %603 = vmatpush3.msra.mxu0 %v243_v8  ;;  %637 = vmatprep.subr.mxu1 %v243_v8 }
  0x59   : > { %604 = vmatprep.subr.mxu0 %v242_v9  ;;  %638 = vmatpush3.msra.mxu1 %v243_v8 }
  0x5a   : > { %605 = vmatpush3.msra.mxu0 %v242_v9  ;;  %639 = vmatprep.subr.mxu1 %v242_v9 }
  0x5b   : > { %606 = vmatprep.subr.mxu0 %v241_v10  ;;  %640 = vmatpush3.msra.mxu1 %v242_v9 }
  0x5c   : > { %607 = vmatpush3.msra.mxu0 %v241_v10  ;;  %641 = vmatprep.subr.mxu1 %v241_v10 }
  0x5d   : > { %608 = vmatprep.subr.mxu0 %v240_v11  ;;  %642 = vmatpush3.msra.mxu1 %v241_v10 }
  0x5e   : > { %609 = vmatpush3.msra.mxu0 %v240_v11  ;;  %643 = vmatprep.subr.mxu1 %v240_v11 }
  0x5f   : > { %610 = vmatprep.subr.mxu0 %v239_v12  ;;  %644 = vmatpush3.msra.mxu1 %v240_v11 }
  0x60   : > { %611 = vmatpush3.msra.mxu0 %v239_v12  ;;  %645 = vmatprep.subr.mxu1 %v239_v12 }
  0x61   : > { %612 = vmatprep.subr.mxu0 %v238_v13  ;;  %646 = vmatpush3.msra.mxu1 %v239_v12 }
  0x62   : > { %613 = vmatpush3.msra.mxu0 %v238_v13  ;;  %647 = vmatprep.subr.mxu1 %v238_v13 }
  0x63   : > { %614 = vmatprep.subr.mxu0 %v237_v14  ;;  %648 = vmatpush3.msra.mxu1 %v238_v13 }
  0x64   : > { %615 = vmatpush3.msra.mxu0 %v237_v14  ;;  %649 = vmatprep.subr.mxu1 %v237_v14 }
  0x65   : > { %616 = vmatprep.subr.mxu0 %v236_v15  ;;  %650 = vmatpush3.msra.mxu1 %v237_v14 }
  0x66   : > { %617 = vmatpush3.msra.mxu0 %v236_v15  ;;  %651 = vmatprep.subr.mxu1 %v236_v15 }
  0x67   : > { %618 = vmatprep.subr.mxu0 %v235_v16  ;;  %652 = vmatpush3.msra.mxu1 %v236_v15 }
  0x68   : > { %619 = vmatpush3.msra.mxu0 %v235_v16  ;;  %653 = vmatprep.subr.mxu1 %v235_v16 }
  0x69   : > { %621 = vmatmul.mubr.f32.vlgmr.msra.gmra.mxu0 %v234_v17  ;;  %654 = vmatpush3.msra.mxu1 %v235_v16 }
 0x129   : > { %v622_v18 = vpop.f32.mrf.mxu0 }
 0x12a   : > { %v327_v19 = vmul.f32 0.0078125, %v622_v18 }
 0x12b   : > { %v317_v20 = vpop.f32.mrf.mxu0 }
 0x12c   : > { %v326_v21 = vmul.f32 0.0078125, %v317_v20  ;;  %v329_v22 = vsub.f32 %v234_v17, %v327_v19 }
 0x12e   : > { %v328_v23 = vsub.f32 %v1017_v4, %v326_v21  ;;  %v331_v25 = vmul.f32 %v329_v22, %v329_v22 }
 0x130   : > { %v330_v24 = vmul.f32 %v328_v23, %v328_v23 }
 0x132   : > { %655 = vmatprep.mubr.f32.mxu1 %v330_v24 }
 0x133   : > { %656 = vmatmul.mubr.f32.vlgmr.msra.gmra.mxu1 %v331_v25 }
 0x1f3   : > { %v657_v26 = vpop.f32.mrf.mxu1 }
 0x1f4   : > { %v408_v27 = vmul.f32 0.0078125, %v657_v26 }
 0x1f5   : > { %v398_v28 = vpop.f32.mrf.mxu1 }
 0x1f6   : > { %v410_v29 = vadd.f32 1e-05, %v408_v27  ;;  %v407_v30 = vmul.f32 0.0078125, %v398_v28 }
 0x1f8   : > { %719 = vrsqrt.f32 %v410_v29  ;;  %v409_v31 = vadd.f32 1e-05, %v407_v30 }
 0x1fa   : > { %721 = vrsqrt.f32 %v409_v31 }
 0x205   : > { %v720_v32 = vpop.eup %719 }
 0x206   : > { %v414_v34 = vmul.f32 %v720_v32, %v329_v22 }
 0x207   : > { %v722_v35 = vpop.eup %721 }
 0x208   : > { %v424_v37 = vmul.f32 %v543_v33, %v414_v34  ;;  %v413_v38 = vmul.f32 %v722_v35, %v328_v23 }
 0x20a   : > { %v432_v39 = vadd.f32 %v544_v36, %v424_v37  ;;  %v423_v40 = vmul.f32 %v543_v33, %v413_v38 }
 0x20c   : > { %v431_v41 = vadd.f32 %v544_v36, %v423_v40  ;;  %434 = vst [vmem:[%s230_s26 + $0x8] sm:$0xff] %v432_v39 }
 0x20e   : > { %433 = vst [vmem:[%s230_s26] sm:$0xff] %v431_v41 }
 0x20f   : > { %790 = shalt.err (!%p787_p0)
}
 0x210   : > { %s791_s12 = scalar_lea.hbm %s1034_s11, 256  ;;  %s795_s23 = scalar_lea.hbm %s1082_s4, 2048 }
 0x211   : > { %p792_p5 = scmp.ne.s32.totalorder %s1034_s11, %s791_s12  ;;  %p796_p4 = scmp.lt.s32.totalorder %s1034_s11, %s1082_s4 }
 0x212   : > { %p797_p6 = scmp.lt.s32.totalorder %s795_s23, %s791_s12 }
 0x213   : > { %p793_p2 = pnand %p792_p5, %p1098_p10 }
 0x214   : > { %p798_p8 = por %p797_p6, %p796_p4 }
 0x215   : > { %p794_p1 = pneg %p793_p2 }
 0x217   : > { %p799_p3 = pnand %p798_p8, %p794_p1 }
 0x219   : > { %802 = shalt.err (!%p799_p3)
}
 0x21a   : > { %s852_s24 = smov 128   ;;  %s853_s26 = smov 8  }
 0x21b   : > { %664 = dma.vmem_to_hbm [thread:$0]  (%p1098_p10), %s1036_s29, 256, %s1034_s11, %s436_s20, %s852_s24, %s852_s24, %s853_s26  }
 0x21c PF: > { %p681_p7 = scmp.ge.s32.totalorder %s845_s18, 2  ;;  %s464_s13 = sand.u32 1, %s833_s15  }
 0x21d   : > { %p1099_p9 = scmp.ne.s32.totalorder %s1088_s22, 0  ;;  %s465_s14 = scalar_lea.sflag [#allocation4], %s464_s13 }
 0x21f   : > { %p675_p11 = pnand %p681_p7, %p1099_p9 }
 0x221   : > { %p676_p12 = pneg %p675_p11 }
 0x223   : > { %828 = dma.done.wait (%p676_p12), %s465_s14, 256  }
 0x224   : > { %830 = vsyncadd (%p676_p12), %s465_s14, 4294967040  ;;  %p18_p13 = scmp.ge.s32.totalorder %s932_s27, 10   ;;  %s1100_s15 = smov %s837_s16 }
 0x225   : > { %s1101_s16 = smov %s841_s17  ;;  %s1102_s17 = smov %s952_s9 }
 0x226   : > { %s1103_s18 = smov %s932_s27  ;;  %20 = sbr.rel (!%p18_p13) target bundleno = 6 (0x6), region = 85 }
 0x22b   :  { %470 = vsyncpa [#allocation3], 1 }
 0x22c   :  { %472 = vsyncpa [#allocation3 + $0x1], 1 }
 0x22d   :  { %473 = vsyncpa [#allocation6], 1 }
 0x22e   :  { %474 = vsyncpa [#allocation4], 1 }
 0x22f   :  { %476 = vsyncpa [#allocation4 + $0x1], 1 }

</bundles_post_ra>
